<compile_context>
chip_gen: v5e
topology: v5e:2x2
jax: 0.10.0
libtpu: 0.0.40
codegen_flags: <defaults>
</compile_context>

<pallas_src>
import jax
import jax.numpy as jnp
from jax import lax
from jax.experimental import pallas as pl
from jax.experimental.pallas import tpu as pltpu


def seq2seq_kernel(x_ref, wih_e_ref, whh_e_ref, b_e_ref,
                   wih_d_ctx_ref, wih_d_enc_ref, whh_d_ref, b_d_ref,
                   out_ref):
    T = x_ref.shape[0]
    Hp = whh_e_ref.shape[0]
    Ep = whh_d_ref.shape[0]

    # Loop-invariant weight loads hoisted off the recurrence path.
    whh_e = whh_e_ref[...]
    whh_d = whh_d_ref[...]

    # ---- encoder input projection for ALL timesteps in one MXU matmul (bias folded in).
    x_proj = jnp.dot(x_ref[...], wih_e_ref[...],
                     preferred_element_type=jnp.float32) + b_e_ref[...]        # (T, Hp)

    # ---- encoder recurrence (fully unrolled): h_t = tanh(x_proj[t] + h_{t-1} @ W_hh)
    #      Encoder states stay vreg-resident (no VMEM scratch round-trip).
    h = jnp.zeros((1, Hp), jnp.float32)
    enc_rows = []
    for t in range(T):
        h = jnp.tanh(x_proj[t:t + 1, :]
                     + jnp.dot(h, whh_e, preferred_element_type=jnp.float32))
        enc_rows.append(h)
    enc_states = jnp.concatenate(enc_rows, axis=0)                             # (T, Hp)

    # ---- decoder input projection, hoisted out of the decoder loop:
    #      context half (loop-invariant final encoder state) + out_encode half
    #      (one batched matmul over all timesteps), bias folded in.
    ctx_proj = jnp.dot(h, wih_d_ctx_ref[...],
                       preferred_element_type=jnp.float32)                     # (1, Ep)
    dec_proj = (jnp.dot(enc_states, wih_d_enc_ref[...],
                        preferred_element_type=jnp.float32)
                + ctx_proj + b_d_ref[...])                                     # (T, Ep)

    # ---- decoder recurrence (fully unrolled); rows collected into ONE full-tile store.
    hd = jnp.zeros((1, Ep), jnp.float32)
    out_rows = []
    for t in range(T):
        hd = jnp.tanh(dec_proj[t:t + 1, :]
                      + jnp.dot(hd, whh_d, preferred_element_type=jnp.float32))
        out_rows.append(hd)
    out_ref[...] = jnp.concatenate(out_rows, axis=0)                           # (T, Ep)


def _round_up(n, m):
    return ((n + m - 1) // m) * m


def _pad2d(a, rows, cols):
    return jnp.pad(a, ((0, rows - a.shape[0]), (0, cols - a.shape[1])))


def init_params(key, embed_size, num_hiddens):
    """Deterministic synthetic parameters in PyTorch nn.RNN layout."""
    ks = jax.random.split(key, 8)
    H, E = num_hiddens, embed_size
    s_e = 1.0 / jnp.sqrt(H)
    s_d = 1.0 / jnp.sqrt(E)
    u = lambda k, shape, s: jax.random.uniform(k, shape, jnp.float32, -s, s)
    return {
        "wih_e": u(ks[0], (H, E), s_e),       # encoder W_ih
        "whh_e": u(ks[1], (H, H), s_e),       # encoder W_hh
        "bih_e": u(ks[2], (H,), s_e),
        "bhh_e": u(ks[3], (H,), s_e),
        "wih_d": u(ks[4], (E, 2 * H), s_d),   # decoder W_ih (input = 2H)
        "whh_d": u(ks[5], (E, E), s_d),       # decoder W_hh
        "bih_d": u(ks[6], (E,), s_d),
        "bhh_d": u(ks[7], (E,), s_d),
    }


def make_seq2seq(params):
    """One-time parameter preprocessing (transpose / fold / split / pad) + jitted forward.

    Only x is sliced/padded per call; all weight prep is hoisted out of the hot path.
    """
    LANE = 128
    E = params["whh_d"].shape[0]
    H = params["whh_e"].shape[0]
    Ep = _round_up(E, LANE)
    Hp = _round_up(H, LANE)

    wih_e_t = params["wih_e"].T                               # (E, H)
    whh_e_t = params["whh_e"].T                               # (H, H)
    b_e = (params["bih_e"] + params["bhh_e"])[None, :]        # (1, H)

    wih_d_t = params["wih_d"].T                               # (2H, E)
    wih_d_ctx = wih_d_t[:H]                                   # (H, E) multiplies context
    wih_d_enc = wih_d_t[H:]                                   # (H, E) multiplies out_encode
    whh_d_t = params["whh_d"].T                               # (E, E)
    b_d = (params["bih_d"] + params["bhh_d"])[None, :]        # (1, E)

    # Zero-pad feature dims to full 128-lane width once (exact, see header comment).
    weights = (
        _pad2d(wih_e_t, Ep, Hp),
        _pad2d(whh_e_t, Hp, Hp),
        _pad2d(b_e, 1, Hp),
        _pad2d(wih_d_ctx, Hp, Ep),
        _pad2d(wih_d_enc, Hp, Ep),
        _pad2d(whh_d_t, Ep, Ep),
        _pad2d(b_d, 1, Ep),
    )
    weights = jax.tree_util.tree_map(jnp.asarray, weights)

    vmem = pl.BlockSpec(memory_space=pltpu.MemorySpace.VMEM)

    @jax.jit
    def forward(x):
        T, B, _ = x.shape
        # Only batch row B-1 is ever consumed (out[:, -1, :]); batch rows never interact
        # inside an RNN, so slicing here is exact and drops (B-1)/B of the work.
        x_row = x[:, B - 1, :]                                # (T, E)
        x_pad = _pad2d(x_row, T, Ep)                          # (T, Ep)

        out_padded = pl.pallas_call(
            seq2seq_kernel,
            out_shape=jax.ShapeDtypeStruct((T, Ep), jnp.float32),
            in_specs=[vmem] * (1 + len(weights)),
            out_specs=vmem,
        )(x_pad, *weights)
        return out_padded[:, :E]

    return forward


def seq2seq_reference(x, p):
    """Pure-JAX full-batch reference mirroring the PyTorch forward."""
    T, B, E = x.shape
    H = p["whh_e"].shape[0]

    def cell(h, x_t, wih, whh, bih, bhh):
        return jnp.tanh(x_t @ wih.T + h @ whh.T + bih + bhh)

    def enc_scan(h, x_t):
        h = cell(h, x_t, p["wih_e"], p["whh_e"], p["bih_e"], p["bhh_e"])
        return h, h

    h_last, out_enc = lax.scan(enc_scan, jnp.zeros((B, H), jnp.float32), x)
    context = jnp.broadcast_to(h_last, (T, B, H))
    dec_in = jnp.concatenate([context, out_enc], axis=2)

    def dec_scan(h, x_t):
        h = cell(h, x_t, p["wih_d"], p["whh_d"], p["bih_d"], p["bhh_d"])
        return h, h

    _, out_dec = lax.scan(dec_scan, jnp.zeros((B, E), jnp.float32), dec_in)
    return out_dec[:, -1, :]


if __name__ == "__main__":
    T, B = 8, 4                 # seq_len, batch
    embed_size, num_hiddens = 32, 64

    key = jax.random.PRNGKey(0)
    k_x, k_p = jax.random.split(key)
    x = jax.random.normal(k_x, (T, B, embed_size), jnp.float32)
    params = init_params(k_p, embed_size, num_hiddens)

    forward = make_seq2seq(params)   # one-time weight prep + jit

    out = jax.block_until_ready(forward(x))
    ref = jax.block_until_ready(seq2seq_reference(x, params))

    assert out.shape == (T, embed_size), out.shape
    assert jnp.allclose(out, ref, rtol=1e-5, atol=1e-5), \
        f"max abs err {jnp.max(jnp.abs(out - ref))}"

    print("KERNEL_OK")
</pallas_src>

<mosaic_0001>
module attributes {stable_mosaic.version = 11 : i64} {
  func.func @seq2seq_kernel(%arg0: memref<8x128xf32, #tpu.memory_space<vmem>>, %arg1: memref<128x128xf32, #tpu.memory_space<vmem>>, %arg2: memref<128x128xf32, #tpu.memory_space<vmem>>, %arg3: memref<1x128xf32, #tpu.memory_space<vmem>>, %arg4: memref<128x128xf32, #tpu.memory_space<vmem>>, %arg5: memref<128x128xf32, #tpu.memory_space<vmem>>, %arg6: memref<128x128xf32, #tpu.memory_space<vmem>>, %arg7: memref<1x128xf32, #tpu.memory_space<vmem>>, %arg8: memref<8x128xf32, #tpu.memory_space<vmem>>) attributes {dimension_semantics = [], scalar_prefetch = 0 : i64, scratch_operands = 0 : i64, tpu.core_type = #tpu.core_type<tc>} {
    %c0 = arith.constant 0 : index
    %c0_0 = arith.constant 0 : index
    %0 = vector.load %arg2[%c0, %c0_0] : memref<128x128xf32, #tpu.memory_space<vmem>>, vector<128x128xf32>
    %c0_1 = arith.constant 0 : index
    %c0_2 = arith.constant 0 : index
    %1 = vector.load %arg6[%c0_1, %c0_2] : memref<128x128xf32, #tpu.memory_space<vmem>>, vector<128x128xf32>
    %c0_3 = arith.constant 0 : index
    %c0_4 = arith.constant 0 : index
    %2 = vector.load %arg0[%c0_3, %c0_4] : memref<8x128xf32, #tpu.memory_space<vmem>>, vector<8x128xf32>
    %c0_5 = arith.constant 0 : index
    %c0_6 = arith.constant 0 : index
    %3 = vector.load %arg1[%c0_5, %c0_6] : memref<128x128xf32, #tpu.memory_space<vmem>>, vector<128x128xf32>
    %cst = arith.constant dense<0.000000e+00> : vector<8x128xf32>
    %4 = tpu.matmul %2, %3, %cst {dimension_numbers = #tpu.dot_dimension_numbers<[1], [0], [0], [1], [0, 0, 1, 1], [], []>} : vector<8x128xf32>, vector<128x128xf32>, vector<8x128xf32> -> vector<8x128xf32>
    %c0_7 = arith.constant 0 : index
    %c0_8 = arith.constant 0 : index
    %5 = vector.load %arg3[%c0_7, %c0_8] : memref<1x128xf32, #tpu.memory_space<vmem>>, vector<1x128xf32>
    %6 = vector.broadcast %5 : vector<1x128xf32> to vector<8x128xf32>
    %7 = arith.addf %4, %6 : vector<8x128xf32>
    %cst_9 = arith.constant 0.000000e+00 : f32
    %8 = vector.broadcast %cst_9 : f32 to vector<1x128xf32>
    %9 = vector.extract_strided_slice %7 {offsets = [0, 0], sizes = [1, 128], strides = [1, 1]} : vector<8x128xf32> to vector<1x128xf32>
    %cst_10 = arith.constant dense<0.000000e+00> : vector<1x128xf32>
    %10 = tpu.matmul %8, %0, %cst_10 {dimension_numbers = #tpu.dot_dimension_numbers<[1], [0], [0], [1], [0, 0, 1, 1], [], []>} : vector<1x128xf32>, vector<128x128xf32>, vector<1x128xf32> -> vector<1x128xf32>
    %11 = arith.addf %9, %10 : vector<1x128xf32>
    %12 = math.tanh %11 : vector<1x128xf32>
    %13 = vector.extract_strided_slice %7 {offsets = [1, 0], sizes = [1, 128], strides = [1, 1]} : vector<8x128xf32> to vector<1x128xf32>
    %cst_11 = arith.constant dense<0.000000e+00> : vector<1x128xf32>
    %14 = tpu.matmul %12, %0, %cst_11 {dimension_numbers = #tpu.dot_dimension_numbers<[1], [0], [0], [1], [0, 0, 1, 1], [], []>} : vector<1x128xf32>, vector<128x128xf32>, vector<1x128xf32> -> vector<1x128xf32>
    %15 = arith.addf %13, %14 : vector<1x128xf32>
    %16 = math.tanh %15 : vector<1x128xf32>
    %17 = vector.extract_strided_slice %7 {offsets = [2, 0], sizes = [1, 128], strides = [1, 1]} : vector<8x128xf32> to vector<1x128xf32>
    %cst_12 = arith.constant dense<0.000000e+00> : vector<1x128xf32>
    %18 = tpu.matmul %16, %0, %cst_12 {dimension_numbers = #tpu.dot_dimension_numbers<[1], [0], [0], [1], [0, 0, 1, 1], [], []>} : vector<1x128xf32>, vector<128x128xf32>, vector<1x128xf32> -> vector<1x128xf32>
    %19 = arith.addf %17, %18 : vector<1x128xf32>
    %20 = math.tanh %19 : vector<1x128xf32>
    %21 = vector.extract_strided_slice %7 {offsets = [3, 0], sizes = [1, 128], strides = [1, 1]} : vector<8x128xf32> to vector<1x128xf32>
    %cst_13 = arith.constant dense<0.000000e+00> : vector<1x128xf32>
    %22 = tpu.matmul %20, %0, %cst_13 {dimension_numbers = #tpu.dot_dimension_numbers<[1], [0], [0], [1], [0, 0, 1, 1], [], []>} : vector<1x128xf32>, vector<128x128xf32>, vector<1x128xf32> -> vector<1x128xf32>
    %23 = arith.addf %21, %22 : vector<1x128xf32>
    %24 = math.tanh %23 : vector<1x128xf32>
    %25 = vector.extract_strided_slice %7 {offsets = [4, 0], sizes = [1, 128], strides = [1, 1]} : vector<8x128xf32> to vector<1x128xf32>
    %cst_14 = arith.constant dense<0.000000e+00> : vector<1x128xf32>
    %26 = tpu.matmul %24, %0, %cst_14 {dimension_numbers = #tpu.dot_dimension_numbers<[1], [0], [0], [1], [0, 0, 1, 1], [], []>} : vector<1x128xf32>, vector<128x128xf32>, vector<1x128xf32> -> vector<1x128xf32>
    %27 = arith.addf %25, %26 : vector<1x128xf32>
    %28 = math.tanh %27 : vector<1x128xf32>
    %29 = vector.extract_strided_slice %7 {offsets = [5, 0], sizes = [1, 128], strides = [1, 1]} : vector<8x128xf32> to vector<1x128xf32>
    %cst_15 = arith.constant dense<0.000000e+00> : vector<1x128xf32>
    %30 = tpu.matmul %28, %0, %cst_15 {dimension_numbers = #tpu.dot_dimension_numbers<[1], [0], [0], [1], [0, 0, 1, 1], [], []>} : vector<1x128xf32>, vector<128x128xf32>, vector<1x128xf32> -> vector<1x128xf32>
    %31 = arith.addf %29, %30 : vector<1x128xf32>
    %32 = math.tanh %31 : vector<1x128xf32>
    %33 = vector.extract_strided_slice %7 {offsets = [6, 0], sizes = [1, 128], strides = [1, 1]} : vector<8x128xf32> to vector<1x128xf32>
    %cst_16 = arith.constant dense<0.000000e+00> : vector<1x128xf32>
    %34 = tpu.matmul %32, %0, %cst_16 {dimension_numbers = #tpu.dot_dimension_numbers<[1], [0], [0], [1], [0, 0, 1, 1], [], []>} : vector<1x128xf32>, vector<128x128xf32>, vector<1x128xf32> -> vector<1x128xf32>
    %35 = arith.addf %33, %34 : vector<1x128xf32>
    %36 = math.tanh %35 : vector<1x128xf32>
    %37 = vector.extract_strided_slice %7 {offsets = [7, 0], sizes = [1, 128], strides = [1, 1]} : vector<8x128xf32> to vector<1x128xf32>
    %cst_17 = arith.constant dense<0.000000e+00> : vector<1x128xf32>
    %38 = tpu.matmul %36, %0, %cst_17 {dimension_numbers = #tpu.dot_dimension_numbers<[1], [0], [0], [1], [0, 0, 1, 1], [], []>} : vector<1x128xf32>, vector<128x128xf32>, vector<1x128xf32> -> vector<1x128xf32>
    %39 = arith.addf %37, %38 : vector<1x128xf32>
    %40 = math.tanh %39 : vector<1x128xf32>
    %41 = tpu.concatenate %12, %16, %20, %24, %28, %32, %36, %40 in 0 : vector<1x128xf32>, vector<1x128xf32>, vector<1x128xf32>, vector<1x128xf32>, vector<1x128xf32>, vector<1x128xf32>, vector<1x128xf32>, vector<1x128xf32> -> vector<8x128xf32>
    %c0_18 = arith.constant 0 : index
    %c0_19 = arith.constant 0 : index
    %42 = vector.load %arg4[%c0_18, %c0_19] : memref<128x128xf32, #tpu.memory_space<vmem>>, vector<128x128xf32>
    %cst_20 = arith.constant dense<0.000000e+00> : vector<1x128xf32>
    %43 = tpu.matmul %40, %42, %cst_20 {dimension_numbers = #tpu.dot_dimension_numbers<[1], [0], [0], [1], [0, 0, 1, 1], [], []>} : vector<1x128xf32>, vector<128x128xf32>, vector<1x128xf32> -> vector<1x128xf32>
    %c0_21 = arith.constant 0 : index
    %c0_22 = arith.constant 0 : index
    %44 = vector.load %arg5[%c0_21, %c0_22] : memref<128x128xf32, #tpu.memory_space<vmem>>, vector<128x128xf32>
    %cst_23 = arith.constant dense<0.000000e+00> : vector<8x128xf32>
    %45 = tpu.matmul %41, %44, %cst_23 {dimension_numbers = #tpu.dot_dimension_numbers<[1], [0], [0], [1], [0, 0, 1, 1], [], []>} : vector<8x128xf32>, vector<128x128xf32>, vector<8x128xf32> -> vector<8x128xf32>
    %46 = vector.broadcast %43 : vector<1x128xf32> to vector<8x128xf32>
    %47 = arith.addf %45, %46 : vector<8x128xf32>
    %c0_24 = arith.constant 0 : index
    %c0_25 = arith.constant 0 : index
    %48 = vector.load %arg7[%c0_24, %c0_25] : memref<1x128xf32, #tpu.memory_space<vmem>>, vector<1x128xf32>
    %49 = vector.broadcast %48 : vector<1x128xf32> to vector<8x128xf32>
    %50 = arith.addf %47, %49 : vector<8x128xf32>
    %cst_26 = arith.constant 0.000000e+00 : f32
    %51 = vector.broadcast %cst_26 : f32 to vector<1x128xf32>
    %52 = vector.extract_strided_slice %50 {offsets = [0, 0], sizes = [1, 128], strides = [1, 1]} : vector<8x128xf32> to vector<1x128xf32>
    %cst_27 = arith.constant dense<0.000000e+00> : vector<1x128xf32>
    %53 = tpu.matmul %51, %1, %cst_27 {dimension_numbers = #tpu.dot_dimension_numbers<[1], [0], [0], [1], [0, 0, 1, 1], [], []>} : vector<1x128xf32>, vector<128x128xf32>, vector<1x128xf32> -> vector<1x128xf32>
    %54 = arith.addf %52, %53 : vector<1x128xf32>
    %55 = math.tanh %54 : vector<1x128xf32>
    %56 = vector.extract_strided_slice %50 {offsets = [1, 0], sizes = [1, 128], strides = [1, 1]} : vector<8x128xf32> to vector<1x128xf32>
    %cst_28 = arith.constant dense<0.000000e+00> : vector<1x128xf32>
    %57 = tpu.matmul %55, %1, %cst_28 {dimension_numbers = #tpu.dot_dimension_numbers<[1], [0], [0], [1], [0, 0, 1, 1], [], []>} : vector<1x128xf32>, vector<128x128xf32>, vector<1x128xf32> -> vector<1x128xf32>
    %58 = arith.addf %56, %57 : vector<1x128xf32>
    %59 = math.tanh %58 : vector<1x128xf32>
    %60 = vector.extract_strided_slice %50 {offsets = [2, 0], sizes = [1, 128], strides = [1, 1]} : vector<8x128xf32> to vector<1x128xf32>
    %cst_29 = arith.constant dense<0.000000e+00> : vector<1x128xf32>
    %61 = tpu.matmul %59, %1, %cst_29 {dimension_numbers = #tpu.dot_dimension_numbers<[1], [0], [0], [1], [0, 0, 1, 1], [], []>} : vector<1x128xf32>, vector<128x128xf32>, vector<1x128xf32> -> vector<1x128xf32>
    %62 = arith.addf %60, %61 : vector<1x128xf32>
    %63 = math.tanh %62 : vector<1x128xf32>
    %64 = vector.extract_strided_slice %50 {offsets = [3, 0], sizes = [1, 128], strides = [1, 1]} : vector<8x128xf32> to vector<1x128xf32>
    %cst_30 = arith.constant dense<0.000000e+00> : vector<1x128xf32>
    %65 = tpu.matmul %63, %1, %cst_30 {dimension_numbers = #tpu.dot_dimension_numbers<[1], [0], [0], [1], [0, 0, 1, 1], [], []>} : vector<1x128xf32>, vector<128x128xf32>, vector<1x128xf32> -> vector<1x128xf32>
    %66 = arith.addf %64, %65 : vector<1x128xf32>
    %67 = math.tanh %66 : vector<1x128xf32>
    %68 = vector.extract_strided_slice %50 {offsets = [4, 0], sizes = [1, 128], strides = [1, 1]} : vector<8x128xf32> to vector<1x128xf32>
    %cst_31 = arith.constant dense<0.000000e+00> : vector<1x128xf32>
    %69 = tpu.matmul %67, %1, %cst_31 {dimension_numbers = #tpu.dot_dimension_numbers<[1], [0], [0], [1], [0, 0, 1, 1], [], []>} : vector<1x128xf32>, vector<128x128xf32>, vector<1x128xf32> -> vector<1x128xf32>
    %70 = arith.addf %68, %69 : vector<1x128xf32>
    %71 = math.tanh %70 : vector<1x128xf32>
    %72 = vector.extract_strided_slice %50 {offsets = [5, 0], sizes = [1, 128], strides = [1, 1]} : vector<8x128xf32> to vector<1x128xf32>
    %cst_32 = arith.constant dense<0.000000e+00> : vector<1x128xf32>
    %73 = tpu.matmul %71, %1, %cst_32 {dimension_numbers = #tpu.dot_dimension_numbers<[1], [0], [0], [1], [0, 0, 1, 1], [], []>} : vector<1x128xf32>, vector<128x128xf32>, vector<1x128xf32> -> vector<1x128xf32>
    %74 = arith.addf %72, %73 : vector<1x128xf32>
    %75 = math.tanh %74 : vector<1x128xf32>
    %76 = vector.extract_strided_slice %50 {offsets = [6, 0], sizes = [1, 128], strides = [1, 1]} : vector<8x128xf32> to vector<1x128xf32>
    %cst_33 = arith.constant dense<0.000000e+00> : vector<1x128xf32>
    %77 = tpu.matmul %75, %1, %cst_33 {dimension_numbers = #tpu.dot_dimension_numbers<[1], [0], [0], [1], [0, 0, 1, 1], [], []>} : vector<1x128xf32>, vector<128x128xf32>, vector<1x128xf32> -> vector<1x128xf32>
    %78 = arith.addf %76, %77 : vector<1x128xf32>
    %79 = math.tanh %78 : vector<1x128xf32>
    %80 = vector.extract_strided_slice %50 {offsets = [7, 0], sizes = [1, 128], strides = [1, 1]} : vector<8x128xf32> to vector<1x128xf32>
    %cst_34 = arith.constant dense<0.000000e+00> : vector<1x128xf32>
    %81 = tpu.matmul %79, %1, %cst_34 {dimension_numbers = #tpu.dot_dimension_numbers<[1], [0], [0], [1], [0, 0, 1, 1], [], []>} : vector<1x128xf32>, vector<128x128xf32>, vector<1x128xf32> -> vector<1x128xf32>
    %82 = arith.addf %80, %81 : vector<1x128xf32>
    %83 = math.tanh %82 : vector<1x128xf32>
    %84 = tpu.concatenate %55, %59, %63, %67, %71, %75, %79, %83 in 0 : vector<1x128xf32>, vector<1x128xf32>, vector<1x128xf32>, vector<1x128xf32>, vector<1x128xf32>, vector<1x128xf32>, vector<1x128xf32>, vector<1x128xf32> -> vector<8x128xf32>
    %c0_35 = arith.constant 0 : index
    %c0_36 = arith.constant 0 : index
    %85 = vector.load %arg8[%c0_35, %c0_36] : memref<8x128xf32, #tpu.memory_space<vmem>>, vector<8x128xf32>
    tpu.vector_store %arg8[%c0_35, %c0_36], %84 {strides = array<i32>} : memref<8x128xf32, #tpu.memory_space<vmem>>, vector<8x128xf32>,
    return
  }
}

</mosaic_0001>

<bundles_post_ra>
// kernel: forward.1
= control target key start
LH: loop header
LB: loop body
LE: loop exit
PB: predicated region body
PF: predicated region fallthrough
CT: control target
= control target key end

     0   :  { %13 = vsyncpa [#allocation3], 0  ;;  %s1361_s0 = inlined_call_operand.vmem [shape: f32[8,128], index: 0, kind: input, shape index: {}]   ;;  %s1362_s1 = inlined_call_operand.hbm [shape: f32[128,128], index: 1, kind: input, shape index: {}]   ;;  %s1363_s2 = inlined_call_operand.hbm [shape: f32[128,128], index: 2, kind: input, shape index: {}]   ;;  %s1364_s3 = inlined_call_operand.vmem [shape: f32[1,128], index: 3, kind: input, shape index: {}]   ;;  %s1365_s4 = inlined_call_operand.hbm [shape: f32[128,128], index: 4, kind: input, shape index: {}]   ;;  %s1366_s5 = inlined_call_operand.hbm [shape: f32[128,128], index: 5, kind: input, shape index: {}]   ;;  %s1367_s6 = inlined_call_operand.hbm [shape: f32[128,128], index: 6, kind: input, shape index: {}]   ;;  %s1368_s7 = inlined_call_operand.vmem [shape: f32[1,128], index: 7, kind: input, shape index: {}]   ;;  %s1369_s8 = inlined_call_operand.hbm [shape: f32[8,128], index: 8, kind: output, shape index: {}]  }
   0x1   :  { %14 = vsyncpa [#allocation6], 0 }
   0x2   :  { %15 = vsyncpa [#allocation9], 0 }
   0x3   :  { %16 = vsyncpa [#allocation4], 0  ;;  %s36_s29 = sshll.u32 %s1363_s2, 4  ;;  %s928_s30 = smov [#allocation5]   ;;  %s37_s29 = int_to_ptr.hbm [resolvable:$true] %s36_s29 }
   0x4   :  { %s38_s9 = sshll.u32 %s928_s30, 4  ;;  %s64_s12 = sshll.u32 %s1366_s5, 4  ;;  %s39_s9 = int_to_ptr.vmem [resolvable:$true] %s38_s9  ;;  %s65_s12 = int_to_ptr.hbm [resolvable:$true] %s64_s12 }
   0x5   :  { %s929_s13 = smov 128   ;;  %s930_s14 = smov 8  }
   0x6   :  { %44 = dma.hbm_to_vmem [thread:$0]  %s37_s29, 2048, %s39_s9, [#allocation6], %s929_s13, %s929_s13, %s930_s14  }
   0x7   :  { %s931_s15 = smov [#allocation8]   ;;  %s23_s19 = sshll.u32 %s1362_s1, 4  ;;  %s24_s19 = int_to_ptr.hbm [resolvable:$true] %s23_s19 }
   0x8   :  { %s66_s16 = sshll.u32 %s931_s15, 4  ;;  %s51_s21 = sshll.u32 %s1365_s4, 4  ;;  %s67_s16 = int_to_ptr.vmem [resolvable:$true] %s66_s16  ;;  %s52_s21 = int_to_ptr.hbm [resolvable:$true] %s51_s21 }
   0x9   :  { %72 = dma.hbm_to_vmem [thread:$0]  %s65_s12, 2048, %s67_s16, [#allocation9], %s929_s13, %s929_s13, %s930_s14  }
   0xa   :  { %s932_s22 = smov [#allocation2]   ;;  %s933_s5 = smov [#allocation7]  }
   0xb   :  { %s25_s23 = sshll.u32 %s932_s22, 4  ;;  %s53_s24 = sshll.u32 %s933_s5, 4  ;;  %s26_s23 = int_to_ptr.vmem [resolvable:$true] %s25_s23  ;;  %s54_s24 = int_to_ptr.vmem [resolvable:$true] %s53_s24 }
   0xc   :  { %31 = dma.hbm_to_vmem [thread:$0]  %s24_s19, 2048, %s26_s23, [#allocation3], %s929_s13, %s929_s13, %s930_s14  }
   0xd   :  { %s77_s27 = sshll.u32 %s1367_s6, 4  ;;  %s934_s1 = smov [#allocation10]   ;;  %s78_s27 = int_to_ptr.hbm [resolvable:$true] %s77_s27 }
   0xe   :  { %59 = dma.hbm_to_vmem [thread:$0]  %s52_s21, 2048, %s54_s24, [#allocation6], %s929_s13, %s929_s13, %s930_s14  }
   0xf   :  { %s79_s28 = sshll.u32 %s934_s1, 4  ;;  %s80_s28 = int_to_ptr.vmem [resolvable:$true] %s79_s28 }
  0x10   :  { %85 = dma.hbm_to_vmem [thread:$0]  %s78_s27, 2048, %s80_s28, [#allocation9], %s929_s13, %s929_s13, %s930_s14  }
  0x11   :  { %920 = dma.done.wait [#allocation3], 2048  }
  0x12   :  { %921 = vsyncadd [#allocation3], 4294965248 }
  0x13   :  { %922 = dma.done.wait [#allocation6], 4096  }
  0x14   :  { %923 = vsyncadd [#allocation6], 4294963200 }
  0x15   :  { %924 = dma.done.wait [#allocation9], 4096  }
  0x16   :  { %925 = vsyncadd [#allocation9], 4294963200  ;;  %v156_v0 = vld [vmem:[#allocation2 + $0x78] sm:$0xff]  ;;  %v155_v1 = vld [vmem:[#allocation2 + $0x70] sm:$0xff]  ;;  %v935_v33 = vmov 0.0   ;;  %vm396_vm0 = vcmask 1040384  }
  0x17   :  { %v997_v2 = vld [vmem:[#allocation5 + $0x78] sm:$0xff]  ;;  %161 = vmatpush.msra.mxu0 %v156_v0  ;;  %v1000_v3 = vld [vmem:[#allocation5 + $0x70] sm:$0xff]  ;;  %v154_v4 = vld [vmem:[#allocation2 + $0x68] sm:$0xff]  ;;  %vm398_vm1 = vcmask 1041408   ;;  %vm400_vm2 = vcmask 1042432   ;;  %vm402_vm3 = vcmask 1043456  }
  0x18   :  { %181 = vmatpush.msra.mxu1 %v997_v2  ;;  %v1002_v5 = vld [vmem:[#allocation5 + $0x68] sm:$0xff]  ;;  %203 = vmatpush.msra.mxu2 %v997_v2  ;;  %v153_v6 = vld [vmem:[#allocation2 + $0x60] sm:$0xff]  ;;  %v152_v8 = vld [vmem:[#allocation2 + $0x58] sm:$0xff]  ;;  %vm404_vm4 = vcmask 1044480   ;;  %vm406_vm5 = vcmask 1045504   ;;  %vm408_vm6 = vcmask 1046528  }
  0x19   :  { %231 = vmatpush.msra.mxu3 %v997_v2  ;;  %162 = vmatpush.msra.mxu0 %v155_v1  ;;  %v1007_v7 = vld [vmem:[#allocation5 + $0x60] sm:$0xff]  ;;  %v1012_v9 = vld [vmem:[#allocation5 + $0x58] sm:$0xff]  ;;  %v151_v10 = vld [vmem:[#allocation2 + $0x50] sm:$0xff]  ;;  %s721_s12 = sshll.u32 %s1369_s8, 4  ;;  %s722_s12 = int_to_ptr.hbm [resolvable:$true] %s721_s12 }
  0x1a   :  { %182 = vmatpush.msra.mxu1 %v1000_v3  ;;  %204 = vmatpush.msra.mxu2 %v1000_v3  ;;  %v1017_v11 = vld [vmem:[#allocation5 + $0x50] sm:$0xff]  ;;  %v150_v12 = vld [vmem:[#allocation2 + $0x48] sm:$0xff]  ;;  %v149_v14 = vld [vmem:[#allocation2 + $0x40] sm:$0xff] }
  0x1b   :  { %232 = vmatpush.msra.mxu3 %v1000_v3  ;;  %163 = vmatpush.msra.mxu0 %v154_v4  ;;  %v1022_v13 = vld [vmem:[#allocation5 + $0x48] sm:$0xff]  ;;  %v1027_v15 = vld [vmem:[#allocation5 + $0x40] sm:$0xff]  ;;  %v148_v16 = vld [vmem:[#allocation2 + $0x38] sm:$0xff] }
  0x1c   :  { %183 = vmatpush.msra.mxu1 %v1002_v5  ;;  %205 = vmatpush.msra.mxu2 %v1002_v5  ;;  %v1032_v17 = vld [vmem:[#allocation5 + $0x38] sm:$0xff]  ;;  %v147_v18 = vld [vmem:[#allocation2 + $0x30] sm:$0xff]  ;;  %v146_v20 = vld [vmem:[#allocation2 + $0x28] sm:$0xff] }
  0x1d   :  { %233 = vmatpush.msra.mxu3 %v1002_v5  ;;  %164 = vmatpush.msra.mxu0 %v153_v6  ;;  %v1037_v19 = vld [vmem:[#allocation5 + $0x30] sm:$0xff]  ;;  %v1042_v21 = vld [vmem:[#allocation5 + $0x28] sm:$0xff]  ;;  %v145_v22 = vld [vmem:[#allocation2 + $0x20] sm:$0xff] }
  0x1e   :  { %184 = vmatpush.msra.mxu1 %v1007_v7  ;;  %206 = vmatpush.msra.mxu2 %v1007_v7  ;;  %v1047_v23 = vld [vmem:[#allocation5 + $0x20] sm:$0xff]  ;;  %v144_v24 = vld [vmem:[#allocation2 + $0x18] sm:$0xff]  ;;  %v143_v26 = vld [vmem:[#allocation2 + $0x10] sm:$0xff] }
  0x1f   :  { %234 = vmatpush.msra.mxu3 %v1007_v7  ;;  %165 = vmatpush.msra.mxu0 %v152_v8  ;;  %v1052_v25 = vld [vmem:[#allocation5 + $0x18] sm:$0xff]  ;;  %v1057_v27 = vld [vmem:[#allocation5 + $0x10] sm:$0xff]  ;;  %v142_v28 = vld [vmem:[#allocation2 + $0x8] sm:$0xff] }
  0x20   :  { %185 = vmatpush.msra.mxu1 %v1012_v9  ;;  %207 = vmatpush.msra.mxu2 %v1012_v9  ;;  %v1062_v29 = vld [vmem:[#allocation5 + $0x8] sm:$0xff]  ;;  %v141_v30 = vld [vmem:[#allocation2] sm:$0xff]  ;;  %v464_v6 = vld [vmem:[#allocation8 + $0x78] sm:$0xff] }
  0x21   :  { %235 = vmatpush.msra.mxu3 %v1012_v9  ;;  %166 = vmatpush.msra.mxu0 %v151_v10  ;;  %v1067_v31 = vld [vmem:[#allocation5] sm:$0xff]  ;;  %v463_v8 = vld [vmem:[#allocation8 + $0x70] sm:$0xff]  ;;  %v1179_v10 = vld [vmem:[#allocation10 + $0x78] sm:$0xff] }
  0x22   :  { %186 = vmatpush.msra.mxu1 %v1017_v11  ;;  %208 = vmatpush.msra.mxu2 %v1017_v11  ;;  %v140_v32 = vld [vmem:[%s1361_s0] sm:$0xff] }
  0x23   :  { %236 = vmatpush.msra.mxu3 %v1017_v11  ;;  %167 = vmatpush.msra.mxu0 %v150_v12  ;;  %v742_v34 = vld [vmem:[%s1364_s3] ss:$0 sm:$0xff]  ;;  %v423_v12 = vld [vmem:[#allocation7 + $0x68] sm:$0xff] }
  0x24   :  { %187 = vmatpush.msra.mxu1 %v1022_v13  ;;  %209 = vmatpush.msra.mxu2 %v1022_v13 }
  0x25   :  { %237 = vmatpush.msra.mxu3 %v1022_v13  ;;  %168 = vmatpush.msra.mxu0 %v149_v14  ;;  %v1185_v14 = vld [vmem:[#allocation10 + $0x68] sm:$0xff] }
  0x26   :  { %188 = vmatpush.msra.mxu1 %v1027_v15  ;;  %210 = vmatpush.msra.mxu2 %v1027_v15 }
  0x27   :  { %238 = vmatpush.msra.mxu3 %v1027_v15  ;;  %169 = vmatpush.msra.mxu0 %v148_v16  ;;  %v422_v16 = vld [vmem:[#allocation7 + $0x60] sm:$0xff] }
  0x28   :  { %189 = vmatpush.msra.mxu1 %v1032_v17  ;;  %211 = vmatpush.msra.mxu2 %v1032_v17 }
  0x29   :  { %239 = vmatpush.msra.mxu3 %v1032_v17  ;;  %170 = vmatpush.msra.mxu0 %v147_v18  ;;  %v460_v18 = vld [vmem:[#allocation8 + $0x58] sm:$0xff] }
  0x2a   :  { %190 = vmatpush.msra.mxu1 %v1037_v19  ;;  %212 = vmatpush.msra.mxu2 %v1037_v19 }
  0x2b   :  { %240 = vmatpush.msra.mxu3 %v1037_v19  ;;  %171 = vmatpush.msra.mxu0 %v146_v20  ;;  %v1193_v20 = vld [vmem:[#allocation10 + $0x58] sm:$0xff] }
  0x2c   :  { %191 = vmatpush.msra.mxu1 %v1042_v21  ;;  %213 = vmatpush.msra.mxu2 %v1042_v21 }
  0x2d   :  { %241 = vmatpush.msra.mxu3 %v1042_v21  ;;  %172 = vmatpush.msra.mxu0 %v145_v22  ;;  %v420_v22 = vld [vmem:[#allocation7 + $0x50] sm:$0xff] }
  0x2e   :  { %192 = vmatpush.msra.mxu1 %v1047_v23  ;;  %214 = vmatpush.msra.mxu2 %v1047_v23 }
  0x2f   :  { %242 = vmatpush.msra.mxu3 %v1047_v23  ;;  %173 = vmatpush.msra.mxu0 %v144_v24  ;;  %v458_v24 = vld [vmem:[#allocation8 + $0x48] sm:$0xff] }
  0x30   :  { %193 = vmatpush.msra.mxu1 %v1052_v25  ;;  %215 = vmatpush.msra.mxu2 %v1052_v25 }
  0x31   :  { %243 = vmatpush.msra.mxu3 %v1052_v25  ;;  %174 = vmatpush.msra.mxu0 %v143_v26  ;;  %v1201_v26 = vld [vmem:[#allocation10 + $0x48] sm:$0xff] }
  0x32   :  { %194 = vmatpush.msra.mxu1 %v1057_v27  ;;  %216 = vmatpush.msra.mxu2 %v1057_v27 }
  0x33   :  { %244 = vmatpush.msra.mxu3 %v1057_v27  ;;  %175 = vmatpush.msra.mxu0 %v142_v28  ;;  %v418_v28 = vld [vmem:[#allocation7 + $0x40] sm:$0xff] }
  0x34   :  { %195 = vmatpush.msra.mxu1 %v1062_v29  ;;  %217 = vmatpush.msra.mxu2 %v1062_v29 }
  0x35   :  { %245 = vmatpush.msra.mxu3 %v1062_v29  ;;  %176 = vmatpush.msra.mxu0 %v141_v30  ;;  %v417_v30 = vld [vmem:[#allocation7 + $0x38] sm:$0xff] }
  0x36   :  { %196 = vmatpush.msra.mxu1 %v1067_v31  ;;  %177 = vmatmul.f32.vlgmr.msra.gmra.mxu0 %v140_v32 }
  0x37   :  { %197 = vmatmul.f32.vlgmr.msra.gmra.mxu1 %v935_v33  ;;  %218 = vmatpush.msra.mxu2 %v1067_v31 }
  0x38   :  { %246 = vmatpush.msra.mxu3 %v1067_v31  ;;  %259 = vmatpush.msrb.mxu0 %v997_v2 }
  0x39   :  { %287 = vmatpush.msrb.mxu1 %v997_v2  ;;  %315 = vmatpush.msrb.mxu2 %v997_v2 }
  0x3a   :  { %343 = vmatpush.msrb.mxu3 %v997_v2  ;;  %260 = vmatpush.msrb.mxu0 %v1000_v3 }
  0x3b   :  { %288 = vmatpush.msrb.mxu1 %v1000_v3  ;;  %316 = vmatpush.msrb.mxu2 %v1000_v3 }
  0x3c   :  { %344 = vmatpush.msrb.mxu3 %v1000_v3  ;;  %261 = vmatpush.msrb.mxu0 %v1002_v5 }
  0x3d   :  { %289 = vmatpush.msrb.mxu1 %v1002_v5  ;;  %317 = vmatpush.msrb.mxu2 %v1002_v5 }
  0x3e   :  { %345 = vmatpush.msrb.mxu3 %v1002_v5  ;;  %262 = vmatpush.msrb.mxu0 %v1007_v7 }
  0x3f   :  { %290 = vmatpush.msrb.mxu1 %v1007_v7  ;;  %318 = vmatpush.msrb.mxu2 %v1007_v7 }
  0x40   :  { %346 = vmatpush.msrb.mxu3 %v1007_v7  ;;  %263 = vmatpush.msrb.mxu0 %v1012_v9 }
  0x41   :  { %291 = vmatpush.msrb.mxu1 %v1012_v9  ;;  %319 = vmatpush.msrb.mxu2 %v1012_v9 }
  0x42   :  { %347 = vmatpush.msrb.mxu3 %v1012_v9  ;;  %264 = vmatpush.msrb.mxu0 %v1017_v11 }
  0x43   :  { %292 = vmatpush.msrb.mxu1 %v1017_v11  ;;  %320 = vmatpush.msrb.mxu2 %v1017_v11 }
  0x44   :  { %348 = vmatpush.msrb.mxu3 %v1017_v11  ;;  %265 = vmatpush.msrb.mxu0 %v1022_v13 }
  0x45   :  { %293 = vmatpush.msrb.mxu1 %v1022_v13  ;;  %321 = vmatpush.msrb.mxu2 %v1022_v13 }
  0x46   :  { %349 = vmatpush.msrb.mxu3 %v1022_v13  ;;  %266 = vmatpush.msrb.mxu0 %v1027_v15 }
  0x47   :  { %294 = vmatpush.msrb.mxu1 %v1027_v15  ;;  %322 = vmatpush.msrb.mxu2 %v1027_v15 }
  0x48   :  { %350 = vmatpush.msrb.mxu3 %v1027_v15  ;;  %267 = vmatpush.msrb.mxu0 %v1032_v17 }
  0x49   :  { %295 = vmatpush.msrb.mxu1 %v1032_v17  ;;  %323 = vmatpush.msrb.mxu2 %v1032_v17 }
  0x4a   :  { %351 = vmatpush.msrb.mxu3 %v1032_v17  ;;  %268 = vmatpush.msrb.mxu0 %v1037_v19 }
  0x4b   :  { %296 = vmatpush.msrb.mxu1 %v1037_v19  ;;  %324 = vmatpush.msrb.mxu2 %v1037_v19 }
  0x4c   :  { %352 = vmatpush.msrb.mxu3 %v1037_v19  ;;  %269 = vmatpush.msrb.mxu0 %v1042_v21 }
  0x4d   :  { %297 = vmatpush.msrb.mxu1 %v1042_v21  ;;  %325 = vmatpush.msrb.mxu2 %v1042_v21 }
  0x4e   :  { %353 = vmatpush.msrb.mxu3 %v1042_v21  ;;  %270 = vmatpush.msrb.mxu0 %v1047_v23 }
  0x4f   :  { %298 = vmatpush.msrb.mxu1 %v1047_v23  ;;  %326 = vmatpush.msrb.mxu2 %v1047_v23 }
  0x50   :  { %354 = vmatpush.msrb.mxu3 %v1047_v23  ;;  %271 = vmatpush.msrb.mxu0 %v1052_v25 }
  0x51   :  { %299 = vmatpush.msrb.mxu1 %v1052_v25  ;;  %327 = vmatpush.msrb.mxu2 %v1052_v25 }
  0x52   :  { %355 = vmatpush.msrb.mxu3 %v1052_v25  ;;  %272 = vmatpush.msrb.mxu0 %v1057_v27 }
  0x53   :  { %300 = vmatpush.msrb.mxu1 %v1057_v27  ;;  %328 = vmatpush.msrb.mxu2 %v1057_v27 }
  0x54   :  { %356 = vmatpush.msrb.mxu3 %v1057_v27  ;;  %273 = vmatpush.msrb.mxu0 %v1062_v29 }
  0x55   :  { %301 = vmatpush.msrb.mxu1 %v1062_v29  ;;  %329 = vmatpush.msrb.mxu2 %v1062_v29 }
  0x56   :  { %357 = vmatpush.msrb.mxu3 %v1062_v29  ;;  %274 = vmatpush.msrb.mxu0 %v1067_v31 }
  0x57   :  { %302 = vmatpush.msrb.mxu1 %v1067_v31  ;;  %330 = vmatpush.msrb.mxu2 %v1067_v31 }
  0x58   :  { %358 = vmatpush.msrb.mxu3 %v1067_v31  ;;  %371 = vmatpush.msra.mxu0 %v997_v2 }
  0x5a   :  { %372 = vmatpush.msra.mxu0 %v1000_v3 }
  0x5c   :  { %373 = vmatpush.msra.mxu0 %v1002_v5 }
  0x5e   :  { %374 = vmatpush.msra.mxu0 %v1007_v7  ;;  %v425_v7 = vld [vmem:[#allocation7 + $0x78] sm:$0xff] }
  0x5f   :  { %429 = vmatpush.msra.mxu1 %v425_v7 }
  0x60   :  { %375 = vmatpush.msra.mxu0 %v1012_v9  ;;  %v424_v9 = vld [vmem:[#allocation7 + $0x70] sm:$0xff] }
  0x61   :  { %430 = vmatpush.msra.mxu1 %v424_v9 }
  0x62   :  { %376 = vmatpush.msra.mxu0 %v1017_v11  ;;  %v462_v11 = vld [vmem:[#allocation8 + $0x68] sm:$0xff] }
  0x63   :  { %431 = vmatpush.msra.mxu1 %v423_v12 }
  0x64   :  { %377 = vmatpush.msra.mxu0 %v1022_v13  ;;  %v1182_v13 = vld [vmem:[#allocation10 + $0x70] sm:$0xff] }
  0x65   :  { %432 = vmatpush.msra.mxu1 %v422_v16 }
  0x66   :  { %378 = vmatpush.msra.mxu0 %v1027_v15  ;;  %v461_v15 = vld [vmem:[#allocation8 + $0x60] sm:$0xff] }
  0x68   :  { %379 = vmatpush.msra.mxu0 %v1032_v17  ;;  %v1189_v17 = vld [vmem:[#allocation10 + $0x60] sm:$0xff] }
  0x6a   :  { %380 = vmatpush.msra.mxu0 %v1037_v19  ;;  %v421_v19 = vld [vmem:[#allocation7 + $0x58] sm:$0xff] }
  0x6b   :  { %433 = vmatpush.msra.mxu1 %v421_v19 }
  0x6c   :  { %381 = vmatpush.msra.mxu0 %v1042_v21  ;;  %v459_v21 = vld [vmem:[#allocation8 + $0x50] sm:$0xff] }
  0x6d   :  { %434 = vmatpush.msra.mxu1 %v420_v22 }
  0x6e   :  { %382 = vmatpush.msra.mxu0 %v1047_v23  ;;  %v1197_v23 = vld [vmem:[#allocation10 + $0x50] sm:$0xff] }
  0x70   :  { %383 = vmatpush.msra.mxu0 %v1052_v25  ;;  %v419_v25 = vld [vmem:[#allocation7 + $0x48] sm:$0xff] }
  0x71   :  { %435 = vmatpush.msra.mxu1 %v419_v25 }
  0x72   :  { %384 = vmatpush.msra.mxu0 %v1057_v27  ;;  %v457_v27 = vld [vmem:[#allocation8 + $0x40] sm:$0xff] }
  0x73   :  { %436 = vmatpush.msra.mxu1 %v418_v28 }
  0x74   :  { %385 = vmatpush.msra.mxu0 %v1062_v29  ;;  %v456_v29 = vld [vmem:[#allocation8 + $0x38] sm:$0xff] }
  0x75   :  { %437 = vmatpush.msra.mxu1 %v417_v30 }
  0x76   :  { %386 = vmatpush.msra.mxu0 %v1067_v31 }
  0xb3   :  { %v178_v35 = vpop.f32.mrf.mxu0 }
  0xb4   :  { %v198_v36 = vpop.f32.mrf.mxu1  ;;  %v1164_v37 = vadd.f32 %v742_v34, %v178_v35 }
  0xb6   :  { %v201_v38 = vadd.f32 %v198_v36, %v1164_v37 }
  0xb8   :  { %744 = vtanh.f32 %v201_v38 }
  0xbe   :  { %v745_v39 = vpop.eup %744 }
  0xbf   :  { %219 = vmatmul.f32.vlgmr.msra.gmra.mxu2 %v745_v39 }
  0xc0   :  { %466 = vmatpush.msra.mxu2 %v464_v6 }
  0xc2   :  { %467 = vmatpush.msra.mxu2 %v463_v8 }
  0xc4   :  { %468 = vmatpush.msra.mxu2 %v462_v11 }
  0xc6   :  { %469 = vmatpush.msra.mxu2 %v461_v15 }
  0xc8   :  { %470 = vmatpush.msra.mxu2 %v460_v18 }
  0xca   :  { %471 = vmatpush.msra.mxu2 %v459_v21 }
  0xcc   :  { %472 = vmatpush.msra.mxu2 %v458_v24 }
  0xce   :  { %473 = vmatpush.msra.mxu2 %v457_v27 }
  0xd0   :  { %474 = vmatpush.msra.mxu2 %v456_v29 }
 0x142   :  { %v220_v40 = vpop.f32.mrf.mxu2 }
 0x143   :  { %v224_v41 = vrot.slane %v220_v40, 7  ;;  %v1212_v40 = vld [vmem:[#allocation10 + $0x40] sm:$0xff] }
 0x145   :  { %v226_v42 = vadd.f32 %v224_v41, %v1164_v37  ;;  %v416_v41 = vld [vmem:[#allocation7 + $0x30] sm:$0xff] }
 0x146   :  { %438 = vmatpush.msra.mxu1 %v416_v41 }
 0x147   :  { %746 = vtanh.f32 %v226_v42  ;;  %v454_v42 = vld [vmem:[#allocation8 + $0x28] sm:$0xff] }
 0x14d   :  { %v747_v43 = vpop.eup %746 }
 0x14e   :  { %v229_v44 = vrot.slane %v747_v43, 1  ;;  %v397_v49 = vsel %vm396_vm0, %v745_v39, %v747_v43  ;;  %v455_v39 = vld [vmem:[#allocation8 + $0x30] sm:$0xff]  ;;  %v1215_v43 = vld [vmem:[#allocation10 + $0x38] sm:$0xff] }
 0x14f   :  { %475 = vmatpush.msra.mxu2 %v455_v39 }
 0x150   :  { %247 = vmatmul.f32.vlgmr.msra.gmra.mxu3 %v229_v44  ;;  %v415_v44 = vld [vmem:[#allocation7 + $0x28] sm:$0xff] }
 0x151   :  { %491 = vmatpush.msra.mxu3 %v1179_v10  ;;  %476 = vmatpush.msra.mxu2 %v454_v42 }
 0x152   :  { %439 = vmatpush.msra.mxu1 %v415_v44 }
 0x153   :  { %492 = vmatpush.msra.mxu3 %v1182_v13 }
 0x155   :  { %493 = vmatpush.msra.mxu3 %v1185_v14 }
 0x157   :  { %494 = vmatpush.msra.mxu3 %v1189_v17 }
 0x159   :  { %495 = vmatpush.msra.mxu3 %v1193_v20 }
 0x15b   :  { %496 = vmatpush.msra.mxu3 %v1197_v23 }
 0x15d   :  { %497 = vmatpush.msra.mxu3 %v1201_v26 }
 0x15f   :  { %498 = vmatpush.msra.mxu3 %v1212_v40 }
 0x161   :  { %499 = vmatpush.msra.mxu3 %v1215_v43 }
 0x1d3   :  { %v248_v45 = vpop.f32.mrf.mxu3 }
 0x1d4   :  { %v252_v46 = vrot.slane %v248_v45, 6  ;;  %v453_v45 = vld [vmem:[#allocation8 + $0x20] sm:$0xff] }
 0x1d5   :  { %477 = vmatpush.msra.mxu2 %v453_v45 }
 0x1d6   :  { %v254_v47 = vadd.f32 %v252_v46, %v1164_v37  ;;  %v1219_v46 = vld [vmem:[#allocation10 + $0x30] sm:$0xff] }
 0x1d7   :  { %500 = vmatpush.msra.mxu3 %v1219_v46 }
 0x1d8   :  { %748 = vtanh.f32 %v254_v47  ;;  %v414_v47 = vld [vmem:[#allocation7 + $0x20] sm:$0xff] }
 0x1d9   :  { %440 = vmatpush.msra.mxu1 %v414_v47 }
 0x1de   :  { %v749_v48 = vpop.eup %748 }
 0x1df   :  { %v257_v50 = vrot.slane %v749_v48, 2  ;;  %v399_v51 = vsel %vm398_vm1, %v397_v49, %v749_v48  ;;  %v452_v48 = vld [vmem:[#allocation8 + $0x18] sm:$0xff]  ;;  %v1223_v49 = vld [vmem:[#allocation10 + $0x28] sm:$0xff] }
 0x1e0   :  { %478 = vmatpush.msra.mxu2 %v452_v48  ;;  %501 = vmatpush.msra.mxu3 %v1223_v49 }
 0x1e1   :  { %275 = vmatmul.f32.vlgmr.msrb.gmra.mxu0 %v257_v50  ;;  %v413_v50 = vld [vmem:[#allocation7 + $0x18] sm:$0xff] }
 0x1e2   :  { %513 = vmatpush.msrb.mxu0 %v1179_v10  ;;  %441 = vmatpush.msra.mxu1 %v413_v50 }
 0x1e4   :  { %514 = vmatpush.msrb.mxu0 %v1182_v13 }
 0x1e6   :  { %515 = vmatpush.msrb.mxu0 %v1185_v14 }
 0x1e8   :  { %516 = vmatpush.msrb.mxu0 %v1189_v17 }
 0x1ea   :  { %517 = vmatpush.msrb.mxu0 %v1193_v20 }
 0x1ec   :  { %518 = vmatpush.msrb.mxu0 %v1197_v23 }
 0x1ee   :  { %519 = vmatpush.msrb.mxu0 %v1201_v26 }
 0x1f0   :  { %520 = vmatpush.msrb.mxu0 %v1212_v40 }
 0x1f2   :  { %521 = vmatpush.msrb.mxu0 %v1215_v43 }
 0x1f4   :  { %522 = vmatpush.msrb.mxu0 %v1219_v46 }
 0x1f6   :  { %523 = vmatpush.msrb.mxu0 %v1223_v49 }
 0x25e   :  { %v276_v52 = vpop.f32.mrf.mxu0 }
 0x25f   :  { %v280_v53 = vrot.slane %v276_v52, 5  ;;  %v1227_v52 = vld [vmem:[#allocation10 + $0x20] sm:$0xff] }
 0x260   :  { %502 = vmatpush.msra.mxu3 %v1227_v52  ;;  %524 = vmatpush.msrb.mxu0 %v1227_v52 }
 0x261   :  { %v282_v54 = vadd.f32 %v280_v53, %v1164_v37  ;;  %v412_v53 = vld [vmem:[#allocation7 + $0x10] sm:$0xff] }
 0x262   :  { %442 = vmatpush.msra.mxu1 %v412_v53 }
 0x263   :  { %750 = vtanh.f32 %v282_v54  ;;  %v450_v54 = vld [vmem:[#allocation8 + $0x8] sm:$0xff] }
 0x269   :  { %v751_v55 = vpop.eup %750 }
 0x26a   :  { %v285_v56 = vrot.slane %v751_v55, 3  ;;  %v401_v57 = vsel %vm400_vm2, %v399_v51, %v751_v55  ;;  %v451_v51 = vld [vmem:[#allocation8 + $0x10] sm:$0xff]  ;;  %v1229_v55 = vld [vmem:[#allocation10 + $0x18] sm:$0xff] }
 0x26b   :  { %479 = vmatpush.msra.mxu2 %v451_v51  ;;  %503 = vmatpush.msra.mxu3 %v1229_v55 }
 0x26c   :  { %303 = vmatmul.f32.vlgmr.msrb.gmra.mxu1 %v285_v56  ;;  %v411_v56 = vld [vmem:[#allocation7 + $0x8] sm:$0xff]  ;;  %525 = vmatpush.msrb.mxu0 %v1229_v55 }
 0x26d   :  { %480 = vmatpush.msra.mxu2 %v450_v54  ;;  %443 = vmatpush.msra.mxu1 %v411_v56 }
 0x2e9   :  { %v304_v58 = vpop.f32.mrf.mxu1 }
 0x2ea   :  { %v308_v59 = vrot.slane %v304_v58, 4  ;;  %v1233_v58 = vld [vmem:[#allocation10 + $0x10] sm:$0xff] }
 0x2eb   :  { %504 = vmatpush.msra.mxu3 %v1233_v58  ;;  %526 = vmatpush.msrb.mxu0 %v1233_v58 }
 0x2ec   :  { %v310_v60 = vadd.f32 %v308_v59, %v1164_v37  ;;  %v410_v59 = vld [vmem:[#allocation7] sm:$0xff] }
 0x2ed   :  { %444 = vmatpush.msra.mxu1 %v410_v59 }
 0x2ee   :  { %752 = vtanh.f32 %v310_v60  ;;  %v1239_v60 = vld [vmem:[#allocation10 + $0x8] sm:$0xff] }
 0x2ef   :  { %505 = vmatpush.msra.mxu3 %v1239_v60  ;;  %541 = vmatpush.msrb.mxu1 %v1179_v10 }
 0x2f0   :  { %527 = vmatpush.msrb.mxu0 %v1239_v60 }
 0x2f1   :  { %542 = vmatpush.msrb.mxu1 %v1182_v13 }
 0x2f3   :  { %543 = vmatpush.msrb.mxu1 %v1185_v14 }
 0x2f4   :  { %v753_v61 = vpop.eup %752 }
 0x2f5   :  { %v313_v62 = vrot.slane %v753_v61, 4  ;;  %v403_v63 = vsel %vm402_vm3, %v401_v57, %v753_v61  ;;  %v449_v57 = vld [vmem:[#allocation8] sm:$0xff]  ;;  %544 = vmatpush.msrb.mxu1 %v1189_v17 }
 0x2f6   :  { %481 = vmatpush.msra.mxu2 %v449_v57  ;;  %v1243_v61 = vld [vmem:[#allocation10] sm:$0xff] }
 0x2f7   :  { %331 = vmatmul.f32.vlgmr.msrb.gmra.mxu2 %v313_v62  ;;  %506 = vmatpush.msra.mxu3 %v1243_v61 }
 0x2f8   :  { %569 = vmatpush.msrb.mxu2 %v1179_v10  ;;  %528 = vmatpush.msrb.mxu0 %v1243_v61 }
 0x2f9   :  { %545 = vmatpush.msrb.mxu1 %v1193_v20 }
 0x2fa   :  { %570 = vmatpush.msrb.mxu2 %v1182_v13 }
 0x2fb   :  { %546 = vmatpush.msrb.mxu1 %v1197_v23 }
 0x2fc   :  { %571 = vmatpush.msrb.mxu2 %v1185_v14 }
 0x2fd   :  { %547 = vmatpush.msrb.mxu1 %v1201_v26 }
 0x2fe   :  { %572 = vmatpush.msrb.mxu2 %v1189_v17 }
 0x2ff   :  { %548 = vmatpush.msrb.mxu1 %v1212_v40 }
 0x300   :  { %573 = vmatpush.msrb.mxu2 %v1193_v20 }
 0x301   :  { %549 = vmatpush.msrb.mxu1 %v1215_v43 }
 0x302   :  { %574 = vmatpush.msrb.mxu2 %v1197_v23 }
 0x303   :  { %550 = vmatpush.msrb.mxu1 %v1219_v46 }
 0x304   :  { %575 = vmatpush.msrb.mxu2 %v1201_v26 }
 0x305   :  { %551 = vmatpush.msrb.mxu1 %v1223_v49 }
 0x306   :  { %576 = vmatpush.msrb.mxu2 %v1212_v40 }
 0x307   :  { %552 = vmatpush.msrb.mxu1 %v1227_v52 }
 0x308   :  { %577 = vmatpush.msrb.mxu2 %v1215_v43 }
 0x309   :  { %553 = vmatpush.msrb.mxu1 %v1229_v55 }
 0x30a   :  { %578 = vmatpush.msrb.mxu2 %v1219_v46 }
 0x30b   :  { %554 = vmatpush.msrb.mxu1 %v1233_v58 }
 0x30c   :  { %579 = vmatpush.msrb.mxu2 %v1223_v49 }
 0x30d   :  { %555 = vmatpush.msrb.mxu1 %v1239_v60 }
 0x30e   :  { %580 = vmatpush.msrb.mxu2 %v1227_v52 }
 0x30f   :  { %556 = vmatpush.msrb.mxu1 %v1243_v61 }
 0x310   :  { %581 = vmatpush.msrb.mxu2 %v1229_v55 }
 0x312   :  { %582 = vmatpush.msrb.mxu2 %v1233_v58 }
 0x314   :  { %583 = vmatpush.msrb.mxu2 %v1239_v60 }
 0x316   :  { %584 = vmatpush.msrb.mxu2 %v1243_v61 }
 0x37a   :  { %v332_v0 = vpop.f32.mrf.mxu2 }
 0x37b   :  { %v336_v1 = vrot.slane %v332_v0, 3 }
 0x37d   :  { %v338_v2 = vadd.f32 %v336_v1, %v1164_v37 }
 0x37f   :  { %754 = vtanh.f32 %v338_v2 }
 0x385   :  { %v755_v3 = vpop.eup %754 }
 0x386   :  { %v341_v4 = vrot.slane %v755_v3, 5  ;;  %v1177_v5 = vsel %vm404_vm4, %v403_v63, %v755_v3 }
 0x388   :  { %359 = vmatmul.f32.vlgmr.msrb.gmra.mxu3 %v341_v4  ;;  %v743_v4 = vld [vmem:[%s1368_s7] ss:$0 sm:$0xff]  ;;  %s936_s7 = smov [#allocation11]  }
 0x389   :  { %597 = vmatpush.msrb.mxu3 %v1179_v10  ;;  %s719_s9 = sshll.u32 %s936_s7, 4  ;;  %s720_s9 = int_to_ptr.vmem [resolvable:$true] %s719_s9 }
 0x38b   :  { %598 = vmatpush.msrb.mxu3 %v1182_v13 }
 0x38d   :  { %599 = vmatpush.msrb.mxu3 %v1185_v14 }
 0x38f   :  { %600 = vmatpush.msrb.mxu3 %v1189_v17 }
 0x390   :  { %507 = vmatmul.f32.vlgmr.msra.gmra.mxu3 %v935_v33 }
 0x391   :  { %601 = vmatpush.msrb.mxu3 %v1193_v20 }
 0x393   :  { %602 = vmatpush.msrb.mxu3 %v1197_v23 }
 0x395   :  { %603 = vmatpush.msrb.mxu3 %v1201_v26 }
 0x397   :  { %604 = vmatpush.msrb.mxu3 %v1212_v40 }
 0x399   :  { %605 = vmatpush.msrb.mxu3 %v1215_v43 }
 0x39b   :  { %606 = vmatpush.msrb.mxu3 %v1219_v46 }
 0x39d   :  { %607 = vmatpush.msrb.mxu3 %v1223_v49 }
 0x39f   :  { %608 = vmatpush.msrb.mxu3 %v1227_v52 }
 0x3a1   :  { %609 = vmatpush.msrb.mxu3 %v1229_v55 }
 0x3a3   :  { %610 = vmatpush.msrb.mxu3 %v1233_v58 }
 0x3a5   :  { %611 = vmatpush.msrb.mxu3 %v1239_v60 }
 0x3a7   :  { %612 = vmatpush.msrb.mxu3 %v1243_v61 }
 0x40b   :  { %v360_v31 = vpop.f32.mrf.mxu3 }
 0x40c   :  { %v364_v32 = vrot.slane %v360_v31, 2 }
 0x40e   :  { %v366_v34 = vadd.f32 %v364_v32, %v1164_v37 }
 0x410   :  { %756 = vtanh.f32 %v366_v34 }
 0x413   :  { %v508_v7 = vpop.f32.mrf.mxu3 }
 0x416   :  { %v757_v35 = vpop.eup %756 }
 0x417   :  { %v369_v36 = vrot.slane %v757_v35, 6  ;;  %v1210_v38 = vsel %vm406_vm5, %v1177_v5, %v757_v35 }
 0x419   :  { %387 = vmatmul.f32.vlgmr.msra.gmra.mxu0 %v369_v36 }
 0x41a   :  { %625 = vmatpush.msra.mxu0 %v1179_v10 }
 0x41c   :  { %626 = vmatpush.msra.mxu0 %v1182_v13 }
 0x41e   :  { %627 = vmatpush.msra.mxu0 %v1185_v14 }
 0x420   :  { %628 = vmatpush.msra.mxu0 %v1189_v17 }
 0x422   :  { %629 = vmatpush.msra.mxu0 %v1193_v20 }
 0x424   :  { %630 = vmatpush.msra.mxu0 %v1197_v23 }
 0x426   :  { %631 = vmatpush.msra.mxu0 %v1201_v26 }
 0x428   :  { %632 = vmatpush.msra.mxu0 %v1212_v40 }
 0x42a   :  { %633 = vmatpush.msra.mxu0 %v1215_v43 }
 0x42c   :  { %634 = vmatpush.msra.mxu0 %v1219_v46 }
 0x42e   :  { %635 = vmatpush.msra.mxu0 %v1223_v49 }
 0x430   :  { %636 = vmatpush.msra.mxu0 %v1227_v52 }
 0x432   :  { %637 = vmatpush.msra.mxu0 %v1229_v55 }
 0x434   :  { %638 = vmatpush.msra.mxu0 %v1233_v58 }
 0x436   :  { %639 = vmatpush.msra.mxu0 %v1239_v60 }
 0x438   :  { %640 = vmatpush.msra.mxu0 %v1243_v61 }
 0x496   :  { %v388_v33 = vpop.f32.mrf.mxu0 }
 0x497   :  { %v392_v62 = vrot.slane %v388_v33, 1 }
 0x499   :  { %v394_v63 = vadd.f32 %v392_v62, %v1164_v37 }
 0x49b   :  { %758 = vtanh.f32 %v394_v63 }
 0x4a1   :  { %v759_v37 = vpop.eup %758 }
 0x4a2   :  { %v409_v0 = vsel %vm408_vm6, %v1210_v38, %v759_v37  ;;  %v427_v1 = vrot.slane %v759_v37, 7 }
 0x4a3   :  { %482 = vmatmul.f32.vlgmr.msra.gmra.mxu2 %v409_v0 }
 0x4a4   :  { %445 = vmatmul.f32.vlgmr.msra.gmra.mxu1 %v427_v1  ;;  %681 = vmatpush.msra.mxu2 %v1179_v10 }
 0x4a5   :  { %653 = vmatpush.msra.mxu1 %v1179_v10 }
 0x4a6   :  { %682 = vmatpush.msra.mxu2 %v1182_v13 }
 0x4a7   :  { %654 = vmatpush.msra.mxu1 %v1182_v13 }
 0x4a8   :  { %683 = vmatpush.msra.mxu2 %v1185_v14 }
 0x4a9   :  { %655 = vmatpush.msra.mxu1 %v1185_v14 }
 0x4aa   :  { %684 = vmatpush.msra.mxu2 %v1189_v17 }
 0x4ab   :  { %656 = vmatpush.msra.mxu1 %v1189_v17 }
 0x4ac   :  { %685 = vmatpush.msra.mxu2 %v1193_v20 }
 0x4ad   :  { %657 = vmatpush.msra.mxu1 %v1193_v20 }
 0x4ae   :  { %686 = vmatpush.msra.mxu2 %v1197_v23 }
 0x4af   :  { %658 = vmatpush.msra.mxu1 %v1197_v23 }
 0x4b0   :  { %687 = vmatpush.msra.mxu2 %v1201_v26 }
 0x4b1   :  { %659 = vmatpush.msra.mxu1 %v1201_v26 }
 0x4b2   :  { %688 = vmatpush.msra.mxu2 %v1212_v40 }
 0x4b3   :  { %660 = vmatpush.msra.mxu1 %v1212_v40 }
 0x4b4   :  { %689 = vmatpush.msra.mxu2 %v1215_v43 }
 0x4b5   :  { %661 = vmatpush.msra.mxu1 %v1215_v43 }
 0x4b6   :  { %690 = vmatpush.msra.mxu2 %v1219_v46 }
 0x4b7   :  { %662 = vmatpush.msra.mxu1 %v1219_v46 }
 0x4b8   :  { %691 = vmatpush.msra.mxu2 %v1223_v49 }
 0x4b9   :  { %663 = vmatpush.msra.mxu1 %v1223_v49 }
 0x4ba   :  { %692 = vmatpush.msra.mxu2 %v1227_v52 }
 0x4bb   :  { %664 = vmatpush.msra.mxu1 %v1227_v52 }
 0x4bc   :  { %693 = vmatpush.msra.mxu2 %v1229_v55 }
 0x4bd   :  { %665 = vmatpush.msra.mxu1 %v1229_v55 }
 0x4be   :  { %694 = vmatpush.msra.mxu2 %v1233_v58 }
 0x4bf   :  { %666 = vmatpush.msra.mxu1 %v1233_v58 }
 0x4c0   :  { %695 = vmatpush.msra.mxu2 %v1239_v60 }
 0x4c1   :  { %667 = vmatpush.msra.mxu1 %v1239_v60 }
 0x4c2   :  { %696 = vmatpush.msra.mxu2 %v1243_v61 }
 0x4c3   :  { %668 = vmatpush.msra.mxu1 %v1243_v61 }
 0x521   :  { %v446_v2 = vpop.f32.mrf.mxu1 }
 0x522   :  { %v465_v3 = vperm.slane %v446_v2, 0 }
 0x526   :  { %v483_v5 = vpop.f32.mrf.mxu2 }
 0x527   :  { %v484_v6 = vadd.f32 %v483_v5, %v465_v3 }
 0x529   :  { %v490_v8 = vadd.f32 %v743_v4, %v484_v6 }
 0x52b   :  { %v511_v9 = vadd.f32 %v508_v7, %v490_v8 }
 0x52d   :  { %760 = vtanh.f32 %v511_v9 }
 0x533   :  { %v761_v10 = vpop.eup %760 }
 0x534   :  { %529 = vmatmul.f32.vlgmr.msrb.gmra.mxu0 %v761_v10 }
 0x5b1   :  { %v530_v11 = vpop.f32.mrf.mxu0 }
 0x5b2   :  { %v534_v12 = vrot.slane %v530_v11, 7 }
 0x5b4   :  { %v536_v13 = vadd.f32 %v534_v12, %v490_v8 }
 0x5b6   :  { %762 = vtanh.f32 %v536_v13 }
 0x5bc   :  { %v763_v14 = vpop.eup %762 }
 0x5bd   :  { %v539_v15 = vrot.slane %v763_v14, 1  ;;  %v706_v20 = vsel %vm396_vm0, %v761_v10, %v763_v14 }
 0x5bf   :  { %557 = vmatmul.f32.vlgmr.msrb.gmra.mxu1 %v539_v15 }
 0x63c   :  { %v558_v16 = vpop.f32.mrf.mxu1 }
 0x63d   :  { %v562_v17 = vrot.slane %v558_v16, 6 }
 0x63f   :  { %v564_v18 = vadd.f32 %v562_v17, %v490_v8 }
 0x641   :  { %764 = vtanh.f32 %v564_v18 }
 0x647   :  { %v765_v19 = vpop.eup %764 }
 0x648   :  { %v567_v21 = vrot.slane %v765_v19, 2  ;;  %v707_v22 = vsel %vm398_vm1, %v706_v20, %v765_v19 }
 0x64a   :  { %585 = vmatmul.f32.vlgmr.msrb.gmra.mxu2 %v567_v21 }
 0x6cd   :  { %v586_v23 = vpop.f32.mrf.mxu2 }
 0x6ce   :  { %v590_v24 = vrot.slane %v586_v23, 5 }
 0x6d0   :  { %v592_v25 = vadd.f32 %v590_v24, %v490_v8 }
 0x6d2   :  { %766 = vtanh.f32 %v592_v25 }
 0x6d8   :  { %v767_v26 = vpop.eup %766 }
 0x6d9   :  { %v595_v27 = vrot.slane %v767_v26, 3  ;;  %v708_v28 = vsel %vm400_vm2, %v707_v22, %v767_v26 }
 0x6db   :  { %613 = vmatmul.f32.vlgmr.msrb.gmra.mxu3 %v595_v27 }
 0x75e   :  { %v614_v29 = vpop.f32.mrf.mxu3 }
 0x75f   :  { %v618_v30 = vrot.slane %v614_v29, 4 }
 0x761   :  { %v620_v31 = vadd.f32 %v618_v30, %v490_v8 }
 0x763   :  { %768 = vtanh.f32 %v620_v31 }
 0x769   :  { %v769_v32 = vpop.eup %768 }
 0x76a   :  { %v623_v34 = vrot.slane %v769_v32, 4  ;;  %v709_v35 = vsel %vm402_vm3, %v708_v28, %v769_v32 }
 0x76c   :  { %641 = vmatmul.f32.vlgmr.msra.gmra.mxu0 %v623_v34 }
 0x7e9   :  { %v642_v36 = vpop.f32.mrf.mxu0 }
 0x7ea   :  { %v646_v38 = vrot.slane %v642_v36, 3 }
 0x7ec   :  { %v648_v39 = vadd.f32 %v646_v38, %v490_v8 }
 0x7ee   :  { %770 = vtanh.f32 %v648_v39 }
 0x7f4   :  { %v771_v40 = vpop.eup %770 }
 0x7f5   :  { %v651_v41 = vrot.slane %v771_v40, 5  ;;  %v710_v42 = vsel %vm404_vm4, %v709_v35, %v771_v40 }
 0x7f7   :  { %669 = vmatmul.f32.vlgmr.msra.gmra.mxu1 %v651_v41 }
 0x874   :  { %v670_v43 = vpop.f32.mrf.mxu1 }
 0x875   :  { %v674_v44 = vrot.slane %v670_v43, 2 }
 0x877   :  { %v676_v45 = vadd.f32 %v674_v44, %v490_v8 }
 0x879   :  { %772 = vtanh.f32 %v676_v45 }
 0x87f   :  { %v773_v46 = vpop.eup %772 }
 0x880   :  { %v679_v47 = vrot.slane %v773_v46, 6  ;;  %v711_v48 = vsel %vm406_vm5, %v710_v42, %v773_v46 }
 0x882   :  { %697 = vmatmul.f32.vlgmr.msra.gmra.mxu2 %v679_v47 }
 0x905   :  { %v698_v49 = vpop.f32.mrf.mxu2 }
 0x906   :  { %v702_v50 = vrot.slane %v698_v49, 1 }
 0x908   :  { %v704_v51 = vadd.f32 %v702_v50, %v490_v8 }
 0x90a   :  { %774 = vtanh.f32 %v704_v51 }
 0x910   :  { %v775_v52 = vpop.eup %774 }
 0x911   :  { %v712_v53 = vsel %vm408_vm6, %v711_v48, %v775_v52 }
 0x912   :  { %713 = vst [vmem:[#allocation11] sm:$0xff] %v712_v53 }
 0x913   :  { %724 = dma.vmem_to_hbm [thread:$0]  %s720_s9, 128, %s722_s12, [#allocation4]  }
 0x914   :  { %926 = dma.done.wait [#allocation4], 128  }
 0x915   :  { %927 = vsyncadd [#allocation4], 4294967168 }
 0x916   :  { %729 = vsyncpa [#allocation3], 1 }
 0x917   :  { %730 = vsyncpa [#allocation6], 1 }
 0x918   :  { %731 = vsyncpa [#allocation9], 1 }
 0x919   :  { %732 = vsyncpa [#allocation4], 1 }

</bundles_post_ra>
